<compile_context>
chip_gen: v5e
topology: v5e:2x2
jax: 0.10.0
libtpu: 0.0.40
codegen_flags: <defaults>
</compile_context>

<pallas_src>
import jax
import jax.numpy as jnp
from jax.experimental import pallas as pl
from jax.experimental.pallas import tpu as pltpu


def _asp_kernel(len_ref, x_ref, wt_ref, b_ref, att_ref, out_ref):
    # len_ref: (B_pad,) int32 in SMEM (scalar-prefetched valid lengths)
    # x_ref:   (block_b, T, D)   block of batch rows
    # wt_ref:  (D, D)            sap_linear weight, pre-transposed (y = x @ W.T + b)
    # b_ref:   (1, D)  f32       sap_linear bias
    # att_ref: (1, 1, D) f32     attention vector
    # out_ref: (block_b, 2, D) f32: sublane 0 = mu, sublane 1 = std
    block_b, T, D = x_ref.shape
    base = pl.program_id(0) * block_b

    x = x_ref[...]                                         # (block_b, T, D)
    # Linear + tanh: one MXU matmul with M = block_b*T rows, f32 accumulate.
    h = jnp.tanh(
        jnp.dot(x.reshape(block_b * T, D), wt_ref[...],
                preferred_element_type=jnp.float32)
        + b_ref[...]
    )                                                      # (block_b*T, D) f32
    h3 = h.reshape(block_b, T, D)

    # Attention scores, lane-major over T (flash-attention pattern with tq == 1).
    att3 = jnp.broadcast_to(att_ref[...], (block_b, 1, D))
    s = jnp.einsum("bqd,bkd->bqk", att3, h3,
                   preferred_element_type=jnp.float32)     # (block_b, 1, T)

    # Validity mask rebuilt in-kernel from the prefetched lengths (SMEM scalars).
    t_idx = jax.lax.broadcasted_iota(jnp.int32, (1, 1, T), 2)
    mask3 = jnp.concatenate(
        [(t_idx < len_ref[base + r]).astype(jnp.float32) for r in range(block_b)],
        axis=0,
    )                                                      # (block_b, 1, T)

    neg_big = jnp.finfo(jnp.float32).min
    s = jnp.where(mask3 > 0.0, s, neg_big)
    smax = jnp.max(s, axis=-1, keepdims=True)              # (block_b, 1, 1)
    e = jnp.exp(s - smax) * mask3                          # (block_b, 1, T)
    denom = jnp.maximum(jnp.sum(e, axis=-1, keepdims=True), 1e-30)
    w = e / denom                                          # (block_b, 1, T)

    # Attentive statistics (f32), time reduction on the MXU.
    xf = x.astype(jnp.float32)
    mu = jnp.einsum("bqk,bkd->bqd", w, xf,
                    preferred_element_type=jnp.float32)    # (block_b, 1, D)
    sq = jnp.einsum("bqk,bkd->bqd", w, xf * xf,
                    preferred_element_type=jnp.float32)    # (block_b, 1, D)
    std = jnp.sqrt(jnp.maximum(sq - mu * mu, 1e-5))

    out_ref[:, 0:1, :] = mu
    out_ref[:, 1:2, :] = std


def attentive_statistics_pooling(xs, mask, weight, bias, attention, block_b=None):
    """xs: (B, T, D), mask: (B, T) contiguous 1s, weight: (D, D), bias: (D,),
    attention: (D, 1). Returns (B, 2*D) = concat(weighted mean, weighted std)."""
    B, T, D = xs.shape
    lengths = jnp.sum(mask.astype(jnp.int32), axis=1)      # (B,)

    if block_b is None:
        # Target block_b*T >= 256 so the linear matmul has a real M dimension,
        # capped at 8 rows per step (VMEM-friendly, also on v7x) and at B so tiny
        # batches don't pay for padded rows.
        block_b = max(1, min(8, B, -(-256 // T)))
    n_blk = -(-B // block_b)
    B_pad = n_blk * block_b

    if B_pad != B:
        xs = jnp.pad(xs, ((0, B_pad - B), (0, 0), (0, 0)))
        # Pad lengths with 1 so padded rows stay finite (they are sliced away below).
        lengths = jnp.pad(lengths, (0, B_pad - B), constant_values=1)

    wt = weight.T.astype(xs.dtype)                 # pre-transposed: y = x @ W.T + b
    b2 = bias.reshape(1, D).astype(jnp.float32)
    att2 = attention.reshape(1, 1, D).astype(jnp.float32)

    # W.T / bias / attention have constant index_maps, so Pallas keeps them resident
    # across grid steps (no re-DMA per batch block).
    grid_spec = pltpu.PrefetchScalarGridSpec(
        num_scalar_prefetch=1,
        grid=(n_blk,),
        in_specs=[
            pl.BlockSpec((block_b, T, D), lambda i, lens: (i, 0, 0)),   # xs block
            pl.BlockSpec((D, D), lambda i, lens: (0, 0)),               # W.T
            pl.BlockSpec((1, D), lambda i, lens: (0, 0)),               # bias
            pl.BlockSpec((1, 1, D), lambda i, lens: (0, 0, 0)),         # attention
        ],
        out_specs=pl.BlockSpec((block_b, 2, D), lambda i, lens: (i, 0, 0)),
    )

    out = pl.pallas_call(
        _asp_kernel,
        out_shape=jax.ShapeDtypeStruct((B_pad, 2, D), jnp.float32),
        grid_spec=grid_spec,
        compiler_params=pltpu.CompilerParams(
            dimension_semantics=("parallel",),
        ),
    )(lengths, xs, wt, b2, att2)

    # (B_pad, 2, D) -> (B_pad, 2D) is a contiguous reshape: [mu | std] per row.
    return out.reshape(B_pad, 2 * D)[:B]


def _reference(xs, mask, weight, bias, attention):
    """Pure-JAX replica of the PyTorch forward (per-sample loop)."""
    outs = []
    for b in range(xs.shape[0]):
        feat_len = int(jnp.sum(mask[b]))
        x = xs[b, :feat_len]                                   # (L, D)
        h = jnp.tanh(x @ weight.T + bias)                      # (L, D)
        w = jax.nn.softmax(h @ attention, axis=0)              # (L, 1)
        mu = jnp.sum(x * w, axis=0)
        std = jnp.sqrt(jnp.maximum(jnp.sum(x * x * w, axis=0) - mu * mu, 1e-5))
        outs.append(jnp.concatenate([mu, std]))
    return jnp.stack(outs)


if __name__ == "__main__":
    B, T, D = 2, 16, 32
    key = jax.random.PRNGKey(0)
    k_x, k_w, k_b, k_a = jax.random.split(key, 4)

    xs = jax.random.normal(k_x, (B, T, D), dtype=jnp.float32)
    # contiguous-ones mask, matching the reference's x[:feat_len] semantics
    lengths = jnp.array([16, 11], dtype=jnp.int32)
    mask = (jnp.arange(T)[None, :] < lengths[:, None]).astype(jnp.float32)  # (B, T)
    mask2 = mask  # unused by the forward pass (kept for signature parity)

    # deterministic parameter init (shapes from nn.Linear(D, D) and attention (D, 1))
    weight = jax.random.normal(k_w, (D, D), dtype=jnp.float32) * 0.1
    bias = jax.random.normal(k_b, (D,), dtype=jnp.float32) * 0.1
    attention = jax.random.normal(k_a, (D, 1), dtype=jnp.float32)

    out = attentive_statistics_pooling(xs, mask, weight, bias, attention)
    out = jax.block_until_ready(out)

    ref = _reference(xs, mask, weight, bias, attention)
    assert out.shape == (B, 2 * D)
    assert jnp.allclose(out, ref, atol=1e-4, rtol=1e-4), (out, ref)

    print("KERNEL_OK")
</pallas_src>

<mosaic_0001>
module attributes {stable_mosaic.version = 11 : i64} {
  func.func @_asp_kernel(%arg0: i32, %arg1: memref<2xi32, #tpu.memory_space<smem>>, %arg2: memref<2x16x32xf32, #tpu.memory_space<vmem>>, %arg3: memref<32x32xf32, #tpu.memory_space<vmem>>, %arg4: memref<1x32xf32, #tpu.memory_space<vmem>>, %arg5: memref<1x1x32xf32, #tpu.memory_space<vmem>>, %arg6: memref<2x2x32xf32, #tpu.memory_space<vmem>>) attributes {dimension_semantics = [#tpu.dimension_semantics<parallel>], iteration_bounds = array<i64: 1>, scalar_prefetch = 1 : i64, scratch_operands = 0 : i64, tpu.core_type = #tpu.core_type<tc>, window_params = [{transform_indices = @transform_0, window_bounds = array<i64: 2, 16, 32>}, {pipeline_mode = #tpu.pipeline_mode<synchronous>, transform_indices = @transform_1, window_bounds = array<i64: 32, 32>}, {pipeline_mode = #tpu.pipeline_mode<synchronous>, transform_indices = @transform_2, window_bounds = array<i64: 1, 32>}, {pipeline_mode = #tpu.pipeline_mode<synchronous>, transform_indices = @transform_3, window_bounds = array<i64: 1, 1, 32>}, {transform_indices = @transform_4, window_bounds = array<i64: 2, 2, 32>}]} {
    %c2_i32 = arith.constant 2 : i32
    %0 = arith.muli %arg0, %c2_i32 : i32
    %c0 = arith.constant 0 : index
    %c0_0 = arith.constant 0 : index
    %c0_1 = arith.constant 0 : index
    %1 = vector.load %arg2[%c0, %c0_0, %c0_1] : memref<2x16x32xf32, #tpu.memory_space<vmem>>, vector<2x16x32xf32>
    %2 = vector.shape_cast %1 : vector<2x16x32xf32> to vector<32x32xf32>
    %c0_2 = arith.constant 0 : index
    %c0_3 = arith.constant 0 : index
    %3 = vector.load %arg3[%c0_2, %c0_3] : memref<32x32xf32, #tpu.memory_space<vmem>>, vector<32x32xf32>
    %cst = arith.constant dense<0.000000e+00> : vector<32x32xf32>
    %4 = tpu.matmul %2, %3, %cst {dimension_numbers = #tpu.dot_dimension_numbers<[1], [0], [0], [1], [0, 0, 1, 1], [], []>} : vector<32x32xf32>, vector<32x32xf32>, vector<32x32xf32> -> vector<32x32xf32>
    %c0_4 = arith.constant 0 : index
    %c0_5 = arith.constant 0 : index
    %5 = vector.load %arg4[%c0_4, %c0_5] : memref<1x32xf32, #tpu.memory_space<vmem>>, vector<1x32xf32>
    %6 = vector.broadcast %5 : vector<1x32xf32> to vector<32x32xf32>
    %7 = arith.addf %4, %6 : vector<32x32xf32>
    %8 = math.tanh %7 : vector<32x32xf32>
    %9 = vector.shape_cast %8 : vector<32x32xf32> to vector<2x16x32xf32>
    %c0_6 = arith.constant 0 : index
    %c0_7 = arith.constant 0 : index
    %c0_8 = arith.constant 0 : index
    %10 = vector.load %arg5[%c0_6, %c0_7, %c0_8] : memref<1x1x32xf32, #tpu.memory_space<vmem>>, vector<1x1x32xf32>
    %11 = vector.shape_cast %10 : vector<1x1x32xf32> to vector<1x1x32xf32>
    %12 = vector.broadcast %11 : vector<1x1x32xf32> to vector<2x1x32xf32>
    "tpu.trace_start"() <{level = 10 : i32, message = "bqd,bkd->bqk"}> : () -> ()
    %cst_9 = arith.constant dense<0.000000e+00> : vector<2x1x16xf32>
    %13 = tpu.matmul %12, %9, %cst_9 {dimension_numbers = #tpu.dot_dimension_numbers<[2], [2], [1], [1], [0, 0, 0, 1, 1, 1], [0], [0]>} : vector<2x1x32xf32>, vector<2x16x32xf32>, vector<2x1x16xf32> -> vector<2x1x16xf32>
    "tpu.trace_stop"() : () -> ()
    %14 = tpu.iota {dimensions = array<i32: 2>} : vector<1x1x16xi32>
    %c0_i32 = arith.constant 0 : i32
    %15 = arith.addi %0, %c0_i32 : i32
    %16 = arith.index_cast %15 : i32 to index
    %17 = memref.load %arg1[%16] : memref<2xi32, #tpu.memory_space<smem>>
    %18 = vector.broadcast %17 : i32 to vector<1x1x16xi32>
    %19 = arith.cmpi slt, %14, %18 : vector<1x1x16xi32>
    %20 = arith.extui %19 : vector<1x1x16xi1> to vector<1x1x16xi32>
    %21 = arith.sitofp %20 : vector<1x1x16xi32> to vector<1x1x16xf32>
    %c1_i32 = arith.constant 1 : i32
    %22 = arith.addi %0, %c1_i32 : i32
    %23 = arith.index_cast %22 : i32 to index
    %24 = memref.load %arg1[%23] : memref<2xi32, #tpu.memory_space<smem>>
    %25 = vector.broadcast %24 : i32 to vector<1x1x16xi32>
    %26 = arith.cmpi slt, %14, %25 : vector<1x1x16xi32>
    %27 = arith.extui %26 : vector<1x1x16xi1> to vector<1x1x16xi32>
    %28 = arith.sitofp %27 : vector<1x1x16xi32> to vector<1x1x16xf32>
    %29 = tpu.concatenate %21, %28 in 0 : vector<1x1x16xf32>, vector<1x1x16xf32> -> vector<2x1x16xf32>
    %cst_10 = arith.constant 0.000000e+00 : f32
    %30 = vector.broadcast %cst_10 : f32 to vector<2x1x16xf32>
    %31 = arith.cmpf ogt, %29, %30 : vector<2x1x16xf32>
    %cst_11 = arith.constant -3.40282347E+38 : f32
    %32 = vector.broadcast %cst_11 : f32 to vector<2x1x16xf32>
    %33 = arith.select %31, %13, %32 : vector<2x1x16xi1>, vector<2x1x16xf32>
    %cst_12 = arith.constant dense<0xFF800000> : vector<2x1xf32>
    %34 = vector.multi_reduction <maximumf>, %33, %cst_12 [2] : vector<2x1x16xf32> to vector<2x1xf32>
    %35 = vector.shape_cast %34 : vector<2x1xf32> to vector<2x1x1xf32>
    %36 = vector.broadcast %35 : vector<2x1x1xf32> to vector<2x1x16xf32>
    %37 = arith.subf %33, %36 : vector<2x1x16xf32>
    %38 = math.exp %37 : vector<2x1x16xf32>
    %39 = arith.mulf %38, %29 : vector<2x1x16xf32>
    %cst_13 = arith.constant dense<0.000000e+00> : vector<2x1xf32>
    %40 = vector.multi_reduction <add>, %39, %cst_13 [2] : vector<2x1x16xf32> to vector<2x1xf32>
    %41 = vector.shape_cast %40 : vector<2x1xf32> to vector<2x1x1xf32>
    %cst_14 = arith.constant 1.000000e-30 : f32
    %42 = vector.broadcast %cst_14 : f32 to vector<2x1x1xf32>
    %43 = arith.maximumf %41, %42 : vector<2x1x1xf32>
    %44 = vector.broadcast %43 : vector<2x1x1xf32> to vector<2x1x16xf32>
    %45 = arith.divf %39, %44 : vector<2x1x16xf32>
    "tpu.trace_start"() <{level = 10 : i32, message = "bqk,bkd->bqd"}> : () -> ()
    %cst_15 = arith.constant dense<0.000000e+00> : vector<2x1x32xf32>
    %46 = tpu.matmul %45, %1, %cst_15 {dimension_numbers = #tpu.dot_dimension_numbers<[2], [1], [1], [2], [0, 0, 0, 1, 1, 2], [0], [0]>} : vector<2x1x16xf32>, vector<2x16x32xf32>, vector<2x1x32xf32> -> vector<2x1x32xf32>
    "tpu.trace_stop"() : () -> ()
    %47 = arith.mulf %1, %1 : vector<2x16x32xf32>
    "tpu.trace_start"() <{level = 10 : i32, message = "bqk,bkd->bqd"}> : () -> ()
    %cst_16 = arith.constant dense<0.000000e+00> : vector<2x1x32xf32>
    %48 = tpu.matmul %45, %47, %cst_16 {dimension_numbers = #tpu.dot_dimension_numbers<[2], [1], [1], [2], [0, 0, 0, 1, 1, 2], [0], [0]>} : vector<2x1x16xf32>, vector<2x16x32xf32>, vector<2x1x32xf32> -> vector<2x1x32xf32>
    "tpu.trace_stop"() : () -> ()
    %49 = arith.mulf %46, %46 : vector<2x1x32xf32>
    %50 = arith.subf %48, %49 : vector<2x1x32xf32>
    %cst_17 = arith.constant 9.99999974E-6 : f32
    %51 = vector.broadcast %cst_17 : f32 to vector<2x1x32xf32>
    %52 = arith.maximumf %50, %51 : vector<2x1x32xf32>
    %53 = math.sqrt %52 : vector<2x1x32xf32>
    %c0_18 = arith.constant 0 : index
    %c0_19 = arith.constant 0 : index
    %c0_20 = arith.constant 0 : index
    %54 = vector.load %arg6[%c0_18, %c0_19, %c0_20] : memref<2x2x32xf32, #tpu.memory_space<vmem>>, vector<2x1x32xf32>
    tpu.vector_store %arg6[%c0_18, %c0_19, %c0_20], %46 {strides = array<i32>} : memref<2x2x32xf32, #tpu.memory_space<vmem>>, vector<2x1x32xf32>,
    %c0_21 = arith.constant 0 : index
    %c1 = arith.constant 1 : index
    %c0_22 = arith.constant 0 : index
    %55 = vector.load %arg6[%c0_21, %c1, %c0_22] : memref<2x2x32xf32, #tpu.memory_space<vmem>>, vector<2x1x32xf32>
    tpu.vector_store %arg6[%c0_21, %c1, %c0_22], %53 {strides = array<i32>} : memref<2x2x32xf32, #tpu.memory_space<vmem>>, vector<2x1x32xf32>,
    return
  }
  func.func @transform_0(%arg0: i32, %arg1: memref<2xi32, #tpu.memory_space<smem>>) -> (i32, i32, i32) {
    %c0_i32 = arith.constant 0 : i32
    %c0_i32_0 = arith.constant 0 : i32
    %c0_i32_1 = arith.constant 0 : i32
    return %arg0, %c0_i32, %c0_i32_0 : i32, i32, i32
  }
  func.func @transform_1(%arg0: i32, %arg1: memref<2xi32, #tpu.memory_space<smem>>) -> (i32, i32) {
    %c0_i32 = arith.constant 0 : i32
    %c0_i32_0 = arith.constant 0 : i32
    %c0_i32_1 = arith.constant 0 : i32
    return %c0_i32, %c0_i32_0 : i32, i32
  }
  func.func @transform_2(%arg0: i32, %arg1: memref<2xi32, #tpu.memory_space<smem>>) -> (i32, i32) {
    %c0_i32 = arith.constant 0 : i32
    %c0_i32_0 = arith.constant 0 : i32
    %c0_i32_1 = arith.constant 0 : i32
    return %c0_i32, %c0_i32_0 : i32, i32
  }
  func.func @transform_3(%arg0: i32, %arg1: memref<2xi32, #tpu.memory_space<smem>>) -> (i32, i32, i32) {
    %c0_i32 = arith.constant 0 : i32
    %c0_i32_0 = arith.constant 0 : i32
    %c0_i32_1 = arith.constant 0 : i32
    %c0_i32_2 = arith.constant 0 : i32
    return %c0_i32, %c0_i32_0, %c0_i32_1 : i32, i32, i32
  }
  func.func @transform_4(%arg0: i32, %arg1: memref<2xi32, #tpu.memory_space<smem>>) -> (i32, i32, i32) {
    %c0_i32 = arith.constant 0 : i32
    %c0_i32_0 = arith.constant 0 : i32
    %c0_i32_1 = arith.constant 0 : i32
    return %arg0, %c0_i32, %c0_i32_0 : i32, i32, i32
  }
}

</mosaic_0001>

<bundles_post_ra>
// kernel: tpu_custom_call.1
= control target key start
LH: loop header
LB: loop body
LE: loop exit
PB: predicated region body
PF: predicated region fallthrough
CT: control target
= control target key end

     0   :  { %s533_s21 = smov [#allocation3]   ;;  %s636_s0 = inlined_call_operand.hbm [shape: s32[2], index: 0, kind: input, shape index: {}]   ;;  %s637_s1 = inlined_call_operand.hbm [shape: f32[2,16,32], index: 1, kind: input, shape index: {}]   ;;  %s638_s2 = inlined_call_operand.hbm [shape: f32[32,32], index: 2, kind: input, shape index: {}]   ;;  %s639_s3 = inlined_call_operand.vmem [shape: f32[1,32], index: 3, kind: input, shape index: {}]   ;;  %s640_s4 = inlined_call_operand.vmem [shape: f32[1,1,32], index: 4, kind: input, shape index: {}]   ;;  %s641_s5 = inlined_call_operand.hbm [shape: f32[2,2,32], index: 5, kind: output, shape index: {}]  }
   0x1   :  { %s11_s20 = sshll.u32 %s636_s0, 4  ;;  %s12_s20 = int_to_ptr.hbm [resolvable:$true] %s11_s20 }
   0x2   :  { %14 = dma.hbm_to_smem %s12_s20, 16, %s533_s21, [#allocation2] }
   0x3   :  { %525 = dma.done.wait [#allocation2], 16 }
   0x4   :  { %526 = vsyncadd [#allocation2], 4294967280 }
   0x5   :  { %17 = sfence }
   0x6   :  { %18 = vsyncpa [#allocation5], 0 }
   0x7   :  { %19 = vsyncpa [#allocation8], 0 }
   0x8   :  { %20 = vsyncpa [#allocation6], 0  ;;  %s25_s24 = sshll.u32 %s637_s1, 4  ;;  %s534_s25 = smov [#allocation4]   ;;  %s26_s24 = int_to_ptr.hbm [resolvable:$true] %s25_s24 }
   0x9   :  { %s27_s26 = sshll.u32 %s534_s25, 4  ;;  %s38_s0 = sshll.u32 %s638_s2, 4  ;;  %s28_s26 = int_to_ptr.vmem [resolvable:$true] %s27_s26  ;;  %s39_s0 = int_to_ptr.hbm [resolvable:$true] %s38_s0 }
   0xa   :  { %s535_s29 = smov 128   ;;  %s536_s30 = smov 8  }
   0xb   :  { %33 = dma.hbm_to_vmem [thread:$0]  %s26_s24, 512, %s28_s26, [#allocation5], %s535_s29, %s535_s29, %s536_s30  }
   0xc   :  { %s537_s6 = smov [#allocation7]  }
   0xd   :  { %s40_s7 = sshll.u32 %s537_s6, 4  ;;  %s41_s7 = int_to_ptr.vmem [resolvable:$true] %s40_s7 }
   0xe   :  { %46 = dma.hbm_to_vmem [thread:$0]  %s39_s0, 512, %s41_s7, [#allocation8], %s535_s29, %s535_s29, %s536_s30  }
   0xf   :  { %527 = dma.done.wait [#allocation5], 512  }
  0x10   :  { %528 = vsyncadd [#allocation5], 4294966784 }
  0x11   :  { %529 = dma.done.wait [#allocation8], 512  }
  0x12   :  { %530 = vsyncadd [#allocation8], 4294966784  ;;  %v67_v0 = vld [vmem:[#allocation7 + $0x18] sm:$0xff]  ;;  %v66_v1 = vld [vmem:[#allocation7 + $0x10] sm:$0xff]  ;;  %vm72_vm0 = vcmask 261120   ;;  %s176_s9 = sld [smem:[#allocation3]]  ;;  %v174_v22 = vlaneseq }
  0x13   :  { %97 = vmatpush.msra.mxu0 %v67_v0  ;;  %407 = vmatpush.msra.mxu3 %v67_v0  ;;  %v65_v2 = vld [vmem:[#allocation7 + $0x8] sm:$0xff]  ;;  %v64_v3 = vld [vmem:[#allocation7] sm:$0xff]  ;;  %v583_v5 = vld [vmem:[#allocation4 + $0x18] sm:$0xff]  ;;  %s401_s10 = sld [smem:[#allocation3 + $0x1]]  ;;  %v538_v25 = vmov 0.0   ;;  %vm191_vm3 = vcmask 122880  }
  0x14   :  { %v581_v4 = vld [vmem:[#allocation4] sm:$0xff]  ;;  %v589_v6 = vld [vmem:[#allocation4 + $0x8] sm:$0xff]  ;;  %v594_v7 = vld [vmem:[#allocation4 + $0x10] sm:$0xff]  ;;  %v175_v23 = vand.u32 127, %v174_v22  ;;  %v294_v49 = vmul.f32 %v583_v5, %v583_v5  ;;  %vm244_vm10 = vcmask 130048   ;;  %vm365_vm15 = vcmask 253952  }
  0x15   :  { %98 = vmatpush.msra.mxu0 %v66_v1  ;;  %408 = vmatpush.msra.mxu3 %v66_v1  ;;  %v420_v9 = vld [vmem:[%s639_s3] ss:$0 sm:$0xff]  ;;  %v292_v47 = vmul.f32 %v589_v6, %v589_v6  ;;  %v291_v48 = vmul.f32 %v581_v4, %v581_v4  ;;  %v293_v50 = vmul.f32 %v594_v7, %v594_v7  ;;  %s376_s14 = sshll.u32 %s641_s5, 4  ;;  %s540_s15 = smov 32   ;;  %s377_s14 = int_to_ptr.hbm [resolvable:$true] %s376_s14 }
  0x16   :  { %v118_v20 = vld [vmem:[%s640_s4] sm:$0x1]  ;;  %s539_s4 = smov [#allocation9]   ;;  %s541_s16 = smov 2  }
  0x17   :  { %99 = vmatpush.msra.mxu0 %v65_v2  ;;  %409 = vmatpush.msra.mxu3 %v65_v2  ;;  %s374_s11 = sshll.u32 %s539_s4, 4  ;;  %s375_s11 = int_to_ptr.vmem [resolvable:$true] %s374_s11 }
  0x18   :  { %v177_v24 = vstv %s176_s9 }
  0x19   :  { %100 = vmatpush.msra.mxu0 %v64_v3  ;;  %410 = vmatpush.msra.mxu3 %v64_v3  ;;  %vm178_vm1 = vcmp.lt.s32.totalorder %v175_v23, %v177_v24  ;;  %v183_v27 = vstv %s401_s10 }
  0x1a   :  { %390 = vmatmul.msk.f32.vlgmr.msra.gmra.mxu0 %vm72_vm0, %v581_v4  ;;  %393 = vmatmul.msk.f32.vlgmr.msra.gmra.mxu3 %vm72_vm0, %v583_v5  ;;  %v400_v26 = vsel %vm178_vm1, 1.0, %v538_v25  ;;  %vm184_vm4 = vcmp.lt.s32.totalorder %v175_v23, %v183_v27 }
  0x1b   :  { %262 = vmatpush.msrb.mxu3 %v589_v6  ;;  %vm187_vm2 = vcmp.gt.f32.partialorder %v400_v26, 0.0  ;;  %v402_v31 = vsel %vm184_vm4, 1.0, %v538_v25 }
  0x1c   :  { %vm188_vm5 = vcmp.gt.f32.partialorder %v402_v31, 0.0 }
  0x1d   :  { %263 = vmatpush.msrb.mxu3 %v581_v4 }
  0x1f   :  { %285 = vmatpush.msra.mxu3 %v583_v5 }
  0x21   :  { %286 = vmatpush.msra.mxu3 %v594_v7 }
  0x22   :  { %391 = vmatmul.msk.f32.gmra.mxu0 %vm72_vm0, %v589_v6 }
  0x2a   :  { %392 = vmatmul.msk.f32.gmra.mxu0 %vm72_vm0, %v594_v7 }
  0x97   :  { %v102_v8 = vpop.f32.mrf.mxu0 }
  0x98   :  { %v103_v14 = vadd.f32 %v420_v9, %v102_v8 }
  0x9d   :  { %v111_v10 = vpop.f32.mrf.mxu3 }
  0x9e   :  { %v112_v11 = vadd.f32 %v420_v9, %v111_v10 }
  0x9f   :  { %v105_v12 = vpop.f32.mrf.mxu0 }
  0xa0   :  { %v106_v13 = vadd.f32 %v420_v9, %v105_v12  ;;  %421 = vtanh.f32 %v112_v11 }
  0xa2   :  { %423 = vtanh.f32 %v106_v13 }
  0xa3   :  { %425 = vtanh.f32 %v103_v14 }
  0xa6   :  { %v422_v15 = vpop.eup %421 }
  0xa7   :  { %v108_v16 = vpop.f32.mrf.mxu0  ;;  %397 = vmatpush.xpose.msk.msra.mxu2 %vm72_vm0, %v422_v15 }
  0xa8   :  { %v424_v17 = vpop.eup %423  ;;  %v109_v18 = vadd.f32 %v420_v9, %v108_v16 }
  0xa9   :  { %394 = vmatpush.xpose.msk.msra.mxu1 %vm72_vm0, %v424_v17  ;;  %v426_v19 = vpop.eup %425 }
  0xaa   :  { %427 = vtanh.f32 %v109_v18 }
  0xad   :  { %395 = vmatpush.xpose.msk.msra.mxu1 %vm72_vm0, %v426_v19 }
  0xb0   :  { %v428_v21 = vpop.eup %427  ;;  %396 = vmatmul.msk.f32.vlgmr.msra.gmra.mxu1 %vm72_vm0, %v118_v20 }
  0xb1   :  { %398 = vmatpush.xpose.msk.msra.mxu2 %vm72_vm0, %v428_v21  ;;  %309 = vmatpush.msrb.mxu1 %v292_v47 }
  0xb3   :  { %310 = vmatpush.msrb.mxu1 %v291_v48 }
  0xb4   :  { %399 = vmatmul.msk.f32.vlgmr.msra.gmra.mxu2 %vm72_vm0, %v118_v20 }
  0xb5   :  { %329 = vmatpush.msrb.mxu2 %v294_v49 }
  0xb7   :  { %330 = vmatpush.msrb.mxu2 %v293_v50 }
 0x12d   :  { %v145_v28 = vpop.f32.mrf.mxu1 }
 0x12e   :  { %v189_v29 = vsel %vm187_vm2, %v145_v28, -3.4028235e+38 }
 0x12f   :  { %v192_v30 = vsel %vm191_vm3, %v189_v29, -inf }
 0x130   :  { %193 = vmax.xlane.f32.xlu0 %v192_v30 }
 0x137   :  { %v171_v32 = vpop.f32.mrf.mxu2 }
 0x138   :  { %v190_v33 = vsel %vm188_vm5, %v171_v32, -3.4028235e+38 }
 0x139   :  { %v195_v34 = vsel %vm191_vm3, %v190_v33, -inf }
 0x13a   :  { %196 = vmax.xlane.f32.xlu0 %v195_v34 }
 0x1a3   :  { %v194_v35 = vpop.xlane.xlu0 %193 }
 0x1a4   :  { %v198_v36 = vsub.f32 %v189_v29, %v194_v35 }
 0x1a6   :  { %v200_v37 = vmul.f32 1.442695, %v198_v36 }
 0x1a8   :  { %429 = vpow2.f32 %v200_v37 }
 0x1ad   :  { %v197_v38 = vpop.xlane.xlu0 %196 }
 0x1ae   :  { %v430_v39 = vpop.eup %429  ;;  %v199_v40 = vsub.f32 %v190_v33, %v197_v38 }
 0x1af   :  { %v204_v41 = vmul.f32 %v430_v39, %v400_v26 }
 0x1b0   :  { %v202_v42 = vmul.f32 1.442695, %v199_v40 }
 0x1b1   :  { %v206_v43 = vsel %vm191_vm3, %v204_v41, 0.0 }
 0x1b2   :  { %431 = vpow2.f32 %v202_v42  ;;  %207 = vadd.xlane.f32.xlu1 %v206_v43 }
 0x1b8   :  { %v432_v44 = vpop.eup %431 }
 0x1b9   :  { %v205_v45 = vmul.f32 %v432_v44, %v402_v31 }
 0x1bb   :  { %v209_v46 = vsel %vm191_vm3, %v205_v45, 0.0 }
 0x1bc   :  { %210 = vadd.xlane.f32.xlu1 %v209_v46 }
 0x225   :  { %v208_v51 = vpop.xlane.xlu1 %207 }
 0x226   :  { %v212_v52 = vmax.f32 %v208_v51, 1e-30 }
 0x228   :  { %433 = vrcp.f32 %v212_v52  ;;  %v225_v58 = vand.u32 2147483648, %v212_v52  ;;  %v223_v60 = vand.u32 2147483647, %v212_v52  ;;  %vm219_vm7 = vweird.f32 %v212_v52 }
 0x22a   :  { %v226_v62 = vor.u32 1.1754944e-38, %v225_v58  ;;  %vm224_vm9 = vcmp.eq.f32.partialorder %v223_v60, 8.507059e+37 }
 0x22e   :  { %v434_v53 = vpop.eup %433 }
 0x22f   :  { %v215_v54 = vmul.f32 %v434_v53, %v212_v52  ;;  %v211_v55 = vpop.xlane.xlu1 %210  ;;  %vm220_vm6 = vweird.f32 %v434_v53 }
 0x230   :  { %v213_v56 = vmax.f32 %v211_v55, 1e-30  ;;  %vm221_vm8 = vmor %vm219_vm7, %vm220_vm6 }
 0x231   :  { %v216_v57 = vsub.f32 1.0, %v215_v54 }
 0x232   :  { %435 = vrcp.f32 %v213_v56  ;;  %v240_v5 = vand.u32 2147483648, %v213_v56  ;;  %v238_v7 = vand.u32 2147483647, %v213_v56  ;;  %vm234_vm12 = vweird.f32 %v213_v56 }
 0x233   :  { %v217_v59 = vmul.f32 %v434_v53, %v216_v57 }
 0x234   :  { %v241_v9 = vor.u32 1.1754944e-38, %v240_v5  ;;  %vm239_vm14 = vcmp.eq.f32.partialorder %v238_v7, 8.507059e+37 }
 0x235   :  { %v218_v61 = vadd.f32 %v434_v53, %v217_v59 }
 0x237   :  { %v222_v63 = vsel %vm221_vm8, %v434_v53, %v218_v61 }
 0x238   :  { %v436_v0 = vpop.eup %435  ;;  %v227_v1 = vsel %vm224_vm9, %v226_v62, %v222_v63 }
 0x239   :  { %v230_v2 = vmul.f32 %v436_v0, %v213_v56  ;;  %v228_v3 = vmul.f32 %v227_v1, %v204_v41  ;;  %vm235_vm11 = vweird.f32 %v436_v0 }
 0x23a   :  { %vm236_vm13 = vmor %vm234_vm12, %vm235_vm11 }
 0x23b   :  { %v231_v4 = vsub.f32 1.0, %v230_v2  ;;  %403 = vmatmul.msk.f32.vlgmr.msrb.gmra.mxu3 %vm244_vm10, %v228_v3  ;;  %405 = vmatmul.msk.f32.vlgmr.msrb.gmra.mxu1 %vm244_vm10, %v228_v3 }
 0x23d   :  { %v232_v6 = vmul.f32 %v436_v0, %v231_v4 }
 0x23f   :  { %v233_v8 = vadd.f32 %v436_v0, %v232_v6 }
 0x241   :  { %v237_v10 = vsel %vm236_vm13, %v436_v0, %v233_v8 }
 0x242   :  { %v242_v11 = vsel %vm239_vm14, %v241_v9, %v237_v10 }
 0x243   :  { %v243_v12 = vmul.f32 %v242_v11, %v205_v45 }
 0x245   :  { %404 = vmatmul.msk.f32.vlgmr.msra.gmra.mxu3 %vm244_vm10, %v243_v12  ;;  %406 = vmatmul.msk.f32.vlgmr.msrb.gmra.mxu2 %vm244_vm10, %v243_v12 }
 0x2b8   :  { %v312_v15 = vpop.f32.mrf.mxu1 }
 0x2be   :  { %v265_v13 = vpop.f32.mrf.mxu3 }
 0x2bf   :  { %v335_v14 = vmul.f32 %v265_v13, %v265_v13  ;;  %366 = vst.msk [vmem:[#allocation9] sm:$0x1] %vm365_vm15, %v265_v13 }
 0x2c1   :  { %v337_v16 = vsub.f32 %v312_v15, %v335_v14 }
 0x2c3   :  { %v339_v17 = vmax.f32 %v337_v16, 1e-05 }
 0x2c5   :  { %437 = vrsqrt.f32 %v339_v17  ;;  %vm348_vm0 = vcmp.eq.f32.partialorder %v339_v17, inf  ;;  %v351_v32 = vand.u32 2147483648, %v339_v17  ;;  %vm350_vm1 = vcmp.eq.f32.partialorder %v339_v17, 0.0 }
 0x2c8   :  { %v288_v18 = vpop.f32.mrf.mxu3  ;;  %v332_v20 = vpop.f32.mrf.mxu2 }
 0x2c9   :  { %v336_v19 = vmul.f32 %v288_v18, %v288_v18  ;;  %367 = vst.msk [vmem:[#allocation9 + $0x2] sm:$0x1] %vm365_vm15, %v288_v18 }
 0x2cb   :  { %v438_v21 = vpop.eup %437  ;;  %v338_v22 = vsub.f32 %v332_v20, %v336_v19 }
 0x2cc   :  { %v342_v23 = vmul.f32 %v438_v21, %v339_v17 }
 0x2cd   :  { %v340_v24 = vmax.f32 %v338_v22, 1e-05 }
 0x2ce   :  { %v343_v25 = vmul.f32 %v438_v21, %v342_v23 }
 0x2cf   :  { %439 = vrsqrt.f32 %v340_v24  ;;  %vm360_vm2 = vcmp.eq.f32.partialorder %v340_v24, inf  ;;  %v363_v40 = vand.u32 2147483648, %v340_v24  ;;  %vm362_vm3 = vcmp.eq.f32.partialorder %v340_v24, 0.0 }
 0x2d0   :  { %v344_v26 = vmul.f32 0.5, %v343_v25 }
 0x2d2   :  { %v345_v27 = vsub.f32 1.5, %v344_v26 }
 0x2d4   :  { %v346_v28 = vmul.f32 %v438_v21, %v345_v27 }
 0x2d5   :  { %v440_v29 = vpop.eup %439 }
 0x2d6   :  { %v347_v30 = vmul.f32 %v346_v28, %v339_v17  ;;  %v354_v31 = vmul.f32 %v440_v29, %v340_v24 }
 0x2d8   :  { %v349_v33 = vsel %vm348_vm0, %v339_v17, %v347_v30  ;;  %v355_v34 = vmul.f32 %v440_v29, %v354_v31 }
 0x2d9   :  { %v352_v35 = vsel %vm350_vm1, %v351_v32, %v349_v33 }
 0x2da   :  { %368 = vst.msk [vmem:[#allocation9 + $0x1] sm:$0x1] %vm365_vm15, %v352_v35  ;;  %v356_v36 = vmul.f32 0.5, %v355_v34 }
 0x2dc   :  { %v357_v37 = vsub.f32 1.5, %v356_v36 }
 0x2de   :  { %v358_v38 = vmul.f32 %v440_v29, %v357_v37 }
 0x2e0   :  { %v359_v39 = vmul.f32 %v358_v38, %v340_v24 }
 0x2e2   :  { %v361_v41 = vsel %vm360_vm2, %v340_v24, %v359_v39 }
 0x2e3   :  { %v364_v42 = vsel %vm362_vm3, %v363_v40, %v361_v41 }
 0x2e4   :  { %369 = vst.msk [vmem:[#allocation9 + $0x3] sm:$0x1] %vm365_vm15, %v364_v42 }
 0x2e5   :  { %382 = dma.vmem_to_hbm [thread:$0]  %s375_s11, 64, %s377_s14, [#allocation6], %s540_s15, %s540_s15, %s541_s16  }
 0x2e6   :  { %531 = dma.done.wait [#allocation6], 64  }
 0x2e7   :  { %532 = vsyncadd [#allocation6], 4294967232 }
 0x2e8   :  { %387 = vsyncpa [#allocation5], 1 }
 0x2e9   :  { %388 = vsyncpa [#allocation8], 1 }
 0x2ea   :  { %389 = vsyncpa [#allocation6], 1 }

</bundles_post_ra>
